<compile_context>
chip_gen: v5e
topology: v5e:2x2
jax: 0.10.0
libtpu: 0.0.40
codegen_flags: <defaults>
</compile_context>

<pallas_src>
import functools
import math

import jax
import jax.numpy as jnp
from jax.experimental import pallas as pl
from jax.experimental.pallas import tpu as pltpu

BN_EPS = 1e-5      # nn.BatchNorm1d default eps
L2_EPS = 1e-12     # F.normalize default eps
LANES = 128


# ---------------------------------------------------------------------------
# Kernel helpers
# ---------------------------------------------------------------------------
def _bn_relu(x, g, be):
    # Training-mode BatchNorm1d + ReLU, folded scale/shift form.
    mu = jnp.mean(x, axis=0, keepdims=True)
    ex2 = jnp.mean(x * x, axis=0, keepdims=True)
    var = jnp.maximum(ex2 - mu * mu, 0.0)          # clamp: cancellation safety
    scale = g * jax.lax.rsqrt(var + BN_EPS)
    shift = be - mu * scale
    return jnp.maximum(x * scale + shift, 0.0)


def _l2_normalize(x):
    # F.normalize(x, dim=-1) == x / max(||x||, eps) == x * rsqrt(max(sumsq, eps^2))
    ss = jnp.sum(x * x, axis=-1, keepdims=True)
    return x * jax.lax.rsqrt(jnp.maximum(ss, L2_EPS * L2_EPS))


def make_kernel(dims):
    d_in, d_h0, d_h1, d_out = dims          # already-doubled feature widths
    del d_h0, d_h1, d_out                   # padded away inside the kernel
    r0 = d_in                               # K-axis split points (8-aligned)
    r1 = d_in + LANES
    r2 = d_in + 2 * LANES

    def kernel(x_ref, w_ref, v_ref, out_ref):
        x = x_ref[...]                                        # (B, d_in)

        # Weight blocks: only sublane (K-axis) slices; lane width is always a
        # multiple of 128 -> no masked loads / lane relayouts.
        w_cat = w_ref[0:r0, :]               # (d_in, 256)  [W0 | W_lin]
        w1 = w_ref[r0:r1, 0:LANES]           # (128, 128)   rows >= d_h0 are 0
        w2 = w_ref[r1:r2, 0:LANES]           # (128, 128)   rows >= d_h1 are 0

        # Packed (1, 128) vectors (zero-padded lanes -> benign no-ops).
        v = v_ref[...]                                        # (8, 128)
        g0, be0 = v[0:1, :], v[1:2, :]
        g1, be1 = v[2:3, :], v[3:4, :]
        b2 = v[4:5, :]

        # Fused matmul: fc layer-0 and residual branch share LHS = x.  Split
        # of the result is at lane 128 -> vreg-aligned, unmasked.
        # (Pre-BN Linear biases dropped: exact no-op under batch statistics.)
        y = jnp.dot(x, w_cat, preferred_element_type=jnp.float32)   # (B, 256)
        h = _bn_relu(y[:, 0:LANES], g0, be0)                         # (B, 128)
        lin = y[:, LANES:2 * LANES]                                  # (B, 128)

        h = _bn_relu(jnp.dot(h, w1, preferred_element_type=jnp.float32), g1, be1)
        fc = jnp.dot(h, w2, preferred_element_type=jnp.float32) + b2
        fc = _l2_normalize(fc)               # padded lanes are 0 -> norm exact

        # Lane-dense (B, 128) full-width stores.
        out_ref[0, :, :] = fc
        out_ref[1, :, :] = lin

    return kernel


# ---------------------------------------------------------------------------
# Parameter construction (deterministic, PyTorch-like init) + lane-dense packing
# ---------------------------------------------------------------------------
def make_params(key, in_dim, hidden_dims, out_dim):
    d_in, d_h0 = 2 * in_dim, 2 * hidden_dims[0]
    d_h1, d_out = 2 * hidden_dims[1], 2 * out_dim
    dims = (d_in, d_h0, d_h1, d_out)
    # Single-MXU-tile packing assumes doubled widths fit one lane block.
    assert max(d_h0, d_h1, d_out) <= LANES and d_in % 8 == 0, dims

    keys = jax.random.split(key, 11)

    def unif(k, shape, bound):
        return jax.random.uniform(k, shape, jnp.float32, -bound, bound)

    # nn.Linear init: U(-1/sqrt(fan_in), 1/sqrt(fan_in)); weights stored
    # pre-transposed as (fan_in, fan_out) so the kernel computes x @ W.
    w0 = unif(keys[0], (d_in, d_h0), 1.0 / math.sqrt(d_in))
    b0 = unif(keys[1], (1, d_h0), 1.0 / math.sqrt(d_in))      # cancelled by BN
    g0 = 1.0 + 0.1 * unif(keys[2], (1, d_h0), 1.0)
    be0 = 0.1 * unif(keys[3], (1, d_h0), 1.0)
    w1 = unif(keys[4], (d_h0, d_h1), 1.0 / math.sqrt(d_h0))
    b1 = unif(keys[5], (1, d_h1), 1.0 / math.sqrt(d_h0))      # cancelled by BN
    g1 = 1.0 + 0.1 * unif(keys[6], (1, d_h1), 1.0)
    be1 = 0.1 * unif(keys[7], (1, d_h1), 1.0)
    w2 = unif(keys[8], (d_h1, d_out), 1.0 / math.sqrt(d_h1))
    b2 = unif(keys[9], (1, d_out), 1.0 / math.sqrt(d_h1))
    wl = unif(keys[10], (d_in, d_out), 1.0 / math.sqrt(d_in)) # residual, bias=False

    raw = (w0, b0, g0, be0, w1, b1, g1, be1, w2, b2, wl)

    # --- pack all weights into one lane-dense buffer (single DMA) ---
    # rows 0:d_in           lanes 0:128   -> W0       lanes 128:256 -> W_lin
    # rows d_in:d_in+128    lanes 0:128   -> W1 (zero-padded to 128 K-rows)
    # rows d_in+128:+256    lanes 0:128   -> W2 (zero-padded to 128 K-rows)
    k_total = d_in + 2 * LANES
    w_packed = jnp.zeros((k_total, 2 * LANES), jnp.float32)
    w_packed = w_packed.at[0:d_in, 0:d_h0].set(w0)
    w_packed = w_packed.at[0:d_in, LANES:LANES + d_out].set(wl)
    w_packed = w_packed.at[d_in:d_in + d_h0, 0:d_h1].set(w1)
    w_packed = w_packed.at[d_in + LANES:d_in + LANES + d_h1, 0:d_out].set(w2)

    # --- pack all (1, F) vectors into one (8, 128) buffer (single DMA) ---
    # Padded lanes stay 0: BN with gamma=0/beta=0 and bias=0 keep them at 0.
    # b0/b1 intentionally NOT packed (training-mode BN cancels them exactly).
    v_packed = jnp.zeros((8, LANES), jnp.float32)
    v_packed = v_packed.at[0, 0:d_h0].set(g0[0])
    v_packed = v_packed.at[1, 0:d_h0].set(be0[0])
    v_packed = v_packed.at[2, 0:d_h1].set(g1[0])
    v_packed = v_packed.at[3, 0:d_h1].set(be1[0])
    v_packed = v_packed.at[4, 0:d_out].set(b2[0])

    return w_packed, v_packed, raw, dims


# ---------------------------------------------------------------------------
# Wrapper (jit-ed so the reshape / lane-slice glue fuses around the kernel)
# ---------------------------------------------------------------------------
@functools.partial(jax.jit, static_argnums=3)
def residual_le_forward(x, w_packed, v_packed, dims):
    d_in, _, _, d_out = dims
    B = x.shape[0]
    x2 = x.reshape(B, d_in).astype(jnp.float32)   # torch .squeeze() of (B,1,2*in)

    out = pl.pallas_call(
        make_kernel(dims),
        out_shape=jax.ShapeDtypeStruct((2, B, LANES), jnp.float32),  # lane-dense
        in_specs=[pl.BlockSpec(memory_space=pltpu.MemorySpace.VMEM)] * 3,
        out_specs=pl.BlockSpec(memory_space=pltpu.MemorySpace.VMEM),
    )(x2, w_packed, v_packed)

    # Single lane-slice back to the logical width; module returns
    # (fc_part, lin_part), each unsqueezed to (B, 1, 2*out).
    out = out[:, :, None, 0:d_out]                # (2, B, 1, d_out)
    return out[0], out[1]


# ---------------------------------------------------------------------------
# Pure-JAX reference (PyTorch math, WITH the BN-cancelled biases) for checking
# ---------------------------------------------------------------------------
def _ref_forward(x, raw, dims):
    d_in, _, _, _ = dims
    (w0, b0, g0, be0, w1, b1, g1, be1, w2, b2, wl) = raw
    B = x.shape[0]
    h = x.reshape(B, d_in).astype(jnp.float32)

    def bn(z, g, be):
        mu = jnp.mean(z, axis=0, keepdims=True)
        var = jnp.mean((z - mu) ** 2, axis=0, keepdims=True)
        return (z - mu) / jnp.sqrt(var + BN_EPS) * g + be

    a = jnp.maximum(bn(h @ w0 + b0, g0, be0), 0.0)
    a = jnp.maximum(bn(a @ w1 + b1, g1, be1), 0.0)
    fc = a @ w2 + b2
    n = jnp.sqrt(jnp.sum(fc * fc, axis=-1, keepdims=True))
    fc = fc / jnp.maximum(n, L2_EPS)
    lin = h @ wl
    return fc[:, None, :], lin[:, None, :]


# ---------------------------------------------------------------------------
if __name__ == "__main__":
    # Small shapes consistent with the module:
    #   in_dim=8, hidden_dims=[16, 12], out_dim=6, batch=8
    #   -> input feature width = 2*in_dim = 16 (real/imag concat convention)
    in_dim, hidden_dims, out_dim, batch = 8, [16, 12], 6, 8

    key = jax.random.PRNGKey(0)
    kx, kp = jax.random.split(key)
    x = jax.random.normal(kx, (batch, 1, 2 * in_dim), dtype=jnp.float32)
    w_packed, v_packed, raw, dims = make_params(kp, in_dim, hidden_dims, out_dim)

    fc_part, lin_part = residual_le_forward(x, w_packed, v_packed, dims)
    jax.block_until_ready((fc_part, lin_part))

    # sanity check against a plain-JAX reference of the PyTorch math
    fc_ref, lin_ref = _ref_forward(x, raw, dims)
    assert fc_part.shape == (batch, 1, 2 * out_dim)
    assert lin_part.shape == (batch, 1, 2 * out_dim)
    assert jnp.allclose(fc_part, fc_ref, atol=1e-5, rtol=1e-5)
    assert jnp.allclose(lin_part, lin_ref, atol=1e-5, rtol=1e-5)

    print("KERNEL_OK")
</pallas_src>

<mosaic_0001>
module attributes {stable_mosaic.version = 11 : i64} {
  func.func @kernel(%arg0: memref<8x16xf32, #tpu.memory_space<vmem>>, %arg1: memref<272x256xf32, #tpu.memory_space<vmem>>, %arg2: memref<8x128xf32, #tpu.memory_space<vmem>>, %arg3: memref<2x8x128xf32, #tpu.memory_space<vmem>>) attributes {dimension_semantics = [], scalar_prefetch = 0 : i64, scratch_operands = 0 : i64, tpu.core_type = #tpu.core_type<tc>} {
    %c0 = arith.constant 0 : index
    %c0_0 = arith.constant 0 : index
    %0 = vector.load %arg0[%c0, %c0_0] : memref<8x16xf32, #tpu.memory_space<vmem>>, vector<8x16xf32>
    %c0_1 = arith.constant 0 : index
    %c0_2 = arith.constant 0 : index
    %1 = vector.load %arg1[%c0_1, %c0_2] : memref<272x256xf32, #tpu.memory_space<vmem>>, vector<16x256xf32>
    %c16 = arith.constant 16 : index
    %c0_3 = arith.constant 0 : index
    %2 = vector.load %arg1[%c16, %c0_3] : memref<272x256xf32, #tpu.memory_space<vmem>>, vector<128x128xf32>
    %c144 = arith.constant 144 : index
    %c0_4 = arith.constant 0 : index
    %3 = vector.load %arg1[%c144, %c0_4] : memref<272x256xf32, #tpu.memory_space<vmem>>, vector<128x128xf32>
    %c0_5 = arith.constant 0 : index
    %c0_6 = arith.constant 0 : index
    %4 = vector.load %arg2[%c0_5, %c0_6] : memref<8x128xf32, #tpu.memory_space<vmem>>, vector<8x128xf32>
    %5 = vector.extract_strided_slice %4 {offsets = [0, 0], sizes = [1, 128], strides = [1, 1]} : vector<8x128xf32> to vector<1x128xf32>
    %6 = vector.extract_strided_slice %4 {offsets = [1, 0], sizes = [1, 128], strides = [1, 1]} : vector<8x128xf32> to vector<1x128xf32>
    %7 = vector.extract_strided_slice %4 {offsets = [2, 0], sizes = [1, 128], strides = [1, 1]} : vector<8x128xf32> to vector<1x128xf32>
    %8 = vector.extract_strided_slice %4 {offsets = [3, 0], sizes = [1, 128], strides = [1, 1]} : vector<8x128xf32> to vector<1x128xf32>
    %9 = vector.extract_strided_slice %4 {offsets = [4, 0], sizes = [1, 128], strides = [1, 1]} : vector<8x128xf32> to vector<1x128xf32>
    %cst = arith.constant dense<0.000000e+00> : vector<8x256xf32>
    %10 = tpu.matmul %0, %1, %cst {dimension_numbers = #tpu.dot_dimension_numbers<[1], [0], [0], [1], [0, 0, 1, 1], [], []>} : vector<8x16xf32>, vector<16x256xf32>, vector<8x256xf32> -> vector<8x256xf32>
    %11 = vector.extract_strided_slice %10 {offsets = [0, 0], sizes = [8, 128], strides = [1, 1]} : vector<8x256xf32> to vector<8x128xf32>
    %cst_7 = arith.constant dense<0.000000e+00> : vector<128xf32>
    %12 = vector.multi_reduction <add>, %11, %cst_7 [0] : vector<8x128xf32> to vector<128xf32>
    %13 = vector.shape_cast %12 : vector<128xf32> to vector<1x128xf32>
    %cst_8 = arith.constant 8.000000e+00 : f32
    %14 = vector.broadcast %cst_8 : f32 to vector<1x128xf32>
    %15 = arith.divf %13, %14 : vector<1x128xf32>
    %16 = arith.mulf %11, %11 : vector<8x128xf32>
    %cst_9 = arith.constant dense<0.000000e+00> : vector<128xf32>
    %17 = vector.multi_reduction <add>, %16, %cst_9 [0] : vector<8x128xf32> to vector<128xf32>
    %18 = vector.shape_cast %17 : vector<128xf32> to vector<1x128xf32>
    %cst_10 = arith.constant 8.000000e+00 : f32
    %19 = vector.broadcast %cst_10 : f32 to vector<1x128xf32>
    %20 = arith.divf %18, %19 : vector<1x128xf32>
    %21 = arith.mulf %15, %15 : vector<1x128xf32>
    %22 = arith.subf %20, %21 : vector<1x128xf32>
    %cst_11 = arith.constant 0.000000e+00 : f32
    %23 = vector.broadcast %cst_11 : f32 to vector<1x128xf32>
    %24 = arith.maximumf %22, %23 : vector<1x128xf32>
    %cst_12 = arith.constant 9.99999974E-6 : f32
    %25 = vector.broadcast %cst_12 : f32 to vector<1x128xf32>
    %26 = arith.addf %24, %25 : vector<1x128xf32>
    %27 = math.rsqrt %26 : vector<1x128xf32>
    %28 = arith.mulf %5, %27 : vector<1x128xf32>
    %29 = arith.mulf %15, %28 : vector<1x128xf32>
    %30 = arith.subf %6, %29 : vector<1x128xf32>
    %31 = vector.broadcast %28 : vector<1x128xf32> to vector<8x128xf32>
    %32 = arith.mulf %11, %31 : vector<8x128xf32>
    %33 = vector.broadcast %30 : vector<1x128xf32> to vector<8x128xf32>
    %34 = arith.addf %32, %33 : vector<8x128xf32>
    %cst_13 = arith.constant 0.000000e+00 : f32
    %35 = vector.broadcast %cst_13 : f32 to vector<8x128xf32>
    %36 = arith.maximumf %34, %35 : vector<8x128xf32>
    %37 = vector.extract_strided_slice %10 {offsets = [0, 128], sizes = [8, 128], strides = [1, 1]} : vector<8x256xf32> to vector<8x128xf32>
    %cst_14 = arith.constant dense<0.000000e+00> : vector<8x128xf32>
    %38 = tpu.matmul %36, %2, %cst_14 {dimension_numbers = #tpu.dot_dimension_numbers<[1], [0], [0], [1], [0, 0, 1, 1], [], []>} : vector<8x128xf32>, vector<128x128xf32>, vector<8x128xf32> -> vector<8x128xf32>
    %cst_15 = arith.constant dense<0.000000e+00> : vector<128xf32>
    %39 = vector.multi_reduction <add>, %38, %cst_15 [0] : vector<8x128xf32> to vector<128xf32>
    %40 = vector.shape_cast %39 : vector<128xf32> to vector<1x128xf32>
    %cst_16 = arith.constant 8.000000e+00 : f32
    %41 = vector.broadcast %cst_16 : f32 to vector<1x128xf32>
    %42 = arith.divf %40, %41 : vector<1x128xf32>
    %43 = arith.mulf %38, %38 : vector<8x128xf32>
    %cst_17 = arith.constant dense<0.000000e+00> : vector<128xf32>
    %44 = vector.multi_reduction <add>, %43, %cst_17 [0] : vector<8x128xf32> to vector<128xf32>
    %45 = vector.shape_cast %44 : vector<128xf32> to vector<1x128xf32>
    %cst_18 = arith.constant 8.000000e+00 : f32
    %46 = vector.broadcast %cst_18 : f32 to vector<1x128xf32>
    %47 = arith.divf %45, %46 : vector<1x128xf32>
    %48 = arith.mulf %42, %42 : vector<1x128xf32>
    %49 = arith.subf %47, %48 : vector<1x128xf32>
    %cst_19 = arith.constant 0.000000e+00 : f32
    %50 = vector.broadcast %cst_19 : f32 to vector<1x128xf32>
    %51 = arith.maximumf %49, %50 : vector<1x128xf32>
    %cst_20 = arith.constant 9.99999974E-6 : f32
    %52 = vector.broadcast %cst_20 : f32 to vector<1x128xf32>
    %53 = arith.addf %51, %52 : vector<1x128xf32>
    %54 = math.rsqrt %53 : vector<1x128xf32>
    %55 = arith.mulf %7, %54 : vector<1x128xf32>
    %56 = arith.mulf %42, %55 : vector<1x128xf32>
    %57 = arith.subf %8, %56 : vector<1x128xf32>
    %58 = vector.broadcast %55 : vector<1x128xf32> to vector<8x128xf32>
    %59 = arith.mulf %38, %58 : vector<8x128xf32>
    %60 = vector.broadcast %57 : vector<1x128xf32> to vector<8x128xf32>
    %61 = arith.addf %59, %60 : vector<8x128xf32>
    %cst_21 = arith.constant 0.000000e+00 : f32
    %62 = vector.broadcast %cst_21 : f32 to vector<8x128xf32>
    %63 = arith.maximumf %61, %62 : vector<8x128xf32>
    %cst_22 = arith.constant dense<0.000000e+00> : vector<8x128xf32>
    %64 = tpu.matmul %63, %3, %cst_22 {dimension_numbers = #tpu.dot_dimension_numbers<[1], [0], [0], [1], [0, 0, 1, 1], [], []>} : vector<8x128xf32>, vector<128x128xf32>, vector<8x128xf32> -> vector<8x128xf32>
    %65 = vector.broadcast %9 : vector<1x128xf32> to vector<8x128xf32>
    %66 = arith.addf %64, %65 : vector<8x128xf32>
    %67 = arith.mulf %66, %66 : vector<8x128xf32>
    %cst_23 = arith.constant dense<0.000000e+00> : vector<8xf32>
    %68 = vector.multi_reduction <add>, %67, %cst_23 [1] : vector<8x128xf32> to vector<8xf32>
    %69 = vector.shape_cast %68 : vector<8xf32> to vector<8x1xf32>
    %cst_24 = arith.constant 1.000000e-24 : f32
    %70 = vector.broadcast %cst_24 : f32 to vector<8x1xf32>
    %71 = arith.maximumf %69, %70 : vector<8x1xf32>
    %72 = math.rsqrt %71 : vector<8x1xf32>
    %73 = vector.broadcast %72 : vector<8x1xf32> to vector<8x128xf32>
    %74 = arith.mulf %66, %73 : vector<8x128xf32>
    %c0_25 = arith.constant 0 : index
    %c0_26 = arith.constant 0 : index
    %c0_27 = arith.constant 0 : index
    %75 = vector.load %arg3[%c0_25, %c0_26, %c0_27] : memref<2x8x128xf32, #tpu.memory_space<vmem>>, vector<1x8x128xf32>
    %76 = vector.shape_cast %75 : vector<1x8x128xf32> to vector<8x128xf32>
    %77 = vector.shape_cast %74 : vector<8x128xf32> to vector<1x8x128xf32>
    tpu.vector_store %arg3[%c0_25, %c0_26, %c0_27], %77 {strides = array<i32>} : memref<2x8x128xf32, #tpu.memory_space<vmem>>, vector<1x8x128xf32>,
    %c1 = arith.constant 1 : index
    %c0_28 = arith.constant 0 : index
    %c0_29 = arith.constant 0 : index
    %78 = vector.load %arg3[%c1, %c0_28, %c0_29] : memref<2x8x128xf32, #tpu.memory_space<vmem>>, vector<1x8x128xf32>
    %79 = vector.shape_cast %78 : vector<1x8x128xf32> to vector<8x128xf32>
    %80 = vector.shape_cast %37 : vector<8x128xf32> to vector<1x8x128xf32>
    tpu.vector_store %arg3[%c1, %c0_28, %c0_29], %80 {strides = array<i32>} : memref<2x8x128xf32, #tpu.memory_space<vmem>>, vector<1x8x128xf32>,
    return
  }
}

</mosaic_0001>

<bundles_post_ra>
// kernel: residual_le_forward.1
= control target key start
LH: loop header
LB: loop body
LE: loop exit
PB: predicated region body
PF: predicated region fallthrough
CT: control target
= control target key end

     0   :  { %8 = vsyncpa [#allocation3], 0  ;;  %s451_s0 = inlined_call_operand.hbm [shape: f32[8,16], index: 0, kind: input, shape index: {}]   ;;  %s452_s1 = inlined_call_operand.hbm [shape: f32[272,256], index: 1, kind: input, shape index: {}]   ;;  %s453_s2 = inlined_call_operand.hbm [shape: f32[8,128], index: 2, kind: input, shape index: {}]   ;;  %s454_s3 = inlined_call_operand.vmem [shape: f32[2,8,128], index: 3, kind: output, shape index: {}]  }
   0x1   :  { %9 = vsyncpa [#allocation5], 0  ;;  %s25_s14 = sshll.u32 %s452_s1, 4  ;;  %s384_s15 = smov [#allocation4]   ;;  %s26_s14 = int_to_ptr.hbm [resolvable:$true] %s25_s14 }
   0x2   :  { %s27_s16 = sshll.u32 %s384_s15, 4  ;;  %s15_s19 = sshll.u32 %s451_s0, 4  ;;  %s28_s16 = int_to_ptr.vmem [resolvable:$true] %s27_s16  ;;  %s16_s19 = int_to_ptr.hbm [resolvable:$true] %s15_s19 }
   0x3   :  { %s385_s20 = smov 256   ;;  %s386_s21 = smov 16  }
   0x4   :  { %33 = dma.hbm_to_vmem [thread:$0]  %s26_s14, 8704, %s28_s16, [#allocation5], %s385_s20, %s385_s20, %s386_s21  }
   0x5   :  { %s387_s22 = smov [#allocation2]   ;;  %s39_s26 = sshll.u32 %s453_s2, 4  ;;  %s40_s26 = int_to_ptr.hbm [resolvable:$true] %s39_s26 }
   0x6   :  { %s17_s23 = sshll.u32 %s387_s22, 4  ;;  %s388_s1 = smov [#allocation6]   ;;  %s18_s23 = int_to_ptr.vmem [resolvable:$true] %s17_s23 }
   0x7   :  { %20 = dma.hbm_to_vmem [thread:$0]  %s16_s19, 128, %s18_s23, [#allocation3]  }
   0x8   :  { %s41_s27 = sshll.u32 %s388_s1, 4  ;;  %s42_s27 = int_to_ptr.vmem [resolvable:$true] %s41_s27 }
   0x9   :  { %44 = dma.hbm_to_vmem [thread:$0]  %s40_s26, 128, %s42_s27, [#allocation5]  }
   0xa   :  { %380 = dma.done.wait [#allocation3], 128  }
   0xb   :  { %381 = vsyncadd [#allocation3], 4294967168 }
   0xc   :  { %382 = dma.done.wait [#allocation5], 8832  }
   0xd   :  { %383 = vsyncadd [#allocation5], 4294958464  ;;  %v60_v0 = vld [vmem:[#allocation4 + $0x10] sm:$0xff]  ;;  %v58_v1 = vld [vmem:[#allocation4] sm:$0xff]  ;;  %vm95_vm0 = vcmask 130048   ;;  %v389_v3 = vmov 8.0  }
   0xe   :  { %113 = vmatpush.msra.mxu0 %v60_v0  ;;  %v419_v2 = vld [vmem:[#allocation2] sm:$0xff]  ;;  %300 = vrcp.f32 %v389_v3  ;;  %v77_v5 = vld [vmem:[#allocation4 + $0x110] sm:$0xff]  ;;  %v76_v6 = vld [vmem:[#allocation4 + $0x100] sm:$0xff] }
   0xf   :  { %186 = vmatpush.msra.mxu2 %v77_v5  ;;  %v75_v8 = vld [vmem:[#allocation4 + $0xf0] sm:$0xff]  ;;  %v74_v9 = vld [vmem:[#allocation4 + $0xe0] sm:$0xff] }
  0x10   :  { %114 = vmatpush.msra.mxu0 %v58_v1  ;;  %v73_v11 = vld [vmem:[#allocation4 + $0xd0] sm:$0xff]  ;;  %v72_v15 = vld [vmem:[#allocation4 + $0xc0] sm:$0xff] }
  0x11   :  { %291 = vmatmul.msk.f32.vlgmr.msra.gmra.mxu0 %vm95_vm0, %v419_v2  ;;  %187 = vmatpush.msra.mxu2 %v76_v6  ;;  %v71_v19 = vld [vmem:[#allocation4 + $0xb0] sm:$0xff]  ;;  %v70_v22 = vld [vmem:[#allocation4 + $0xa0] sm:$0xff] }
  0x12   :  { %v69_v26 = vld [vmem:[#allocation4 + $0x90] sm:$0xff]  ;;  %v68_v29 = vld [vmem:[#allocation4 + $0x80] sm:$0xff] }
  0x13   :  { %188 = vmatpush.msra.mxu2 %v75_v8  ;;  %v67_v33 = vld [vmem:[#allocation4 + $0x70] sm:$0xff]  ;;  %v66_v36 = vld [vmem:[#allocation4 + $0x60] sm:$0xff] }
  0x14   :  { %v301_v4 = vpop.eup %300  ;;  %v65_v37 = vld [vmem:[#allocation4 + $0x50] sm:$0xff]  ;;  %v64_v40 = vld [vmem:[#allocation4 + $0x40] sm:$0xff] }
  0x15   :  { %v146_v7 = vmul.f32 8.0, %v301_v4  ;;  %189 = vmatpush.msra.mxu2 %v74_v9  ;;  %vm150_vm1 = vweird.f32 %v301_v4  ;;  %v63_v42 = vld [vmem:[#allocation4 + $0x30] sm:$0xff]  ;;  %v62_v44 = vld [vmem:[#allocation4 + $0x20] sm:$0xff] }
  0x16   :  { %v433_v51 = vld [vmem:[#allocation6] sm:$0xff]  ;;  %v93_v63 = vld [vmem:[#allocation4 + $0x210] sm:$0xff] }
  0x17   :  { %v147_v10 = vsub.f32 1.0, %v146_v7  ;;  %190 = vmatpush.msra.mxu2 %v73_v11  ;;  %247 = vmatpush.msra.mxu3 %v93_v63  ;;  %v92_v0 = vld [vmem:[#allocation4 + $0x200] sm:$0xff]  ;;  %v91_v1 = vld [vmem:[#allocation4 + $0x1f0] sm:$0xff] }
  0x18   :  { %v90_v3 = vld [vmem:[#allocation4 + $0x1e0] sm:$0xff]  ;;  %v87_v11 = vld [vmem:[#allocation4 + $0x1b0] sm:$0xff] }
  0x19   :  { %v148_v16 = vmul.f32 %v301_v4, %v147_v10  ;;  %191 = vmatpush.msra.mxu2 %v72_v15  ;;  %248 = vmatpush.msra.mxu3 %v92_v0  ;;  %v88_v8 = vld [vmem:[#allocation4 + $0x1c0] sm:$0xff] }
  0x1b   :  { %192 = vmatpush.msra.mxu2 %v71_v19  ;;  %v149_v23 = vadd.f32 %v301_v4, %v148_v16  ;;  %249 = vmatpush.msra.mxu3 %v91_v1 }
  0x1d   :  { %193 = vmatpush.msra.mxu2 %v70_v22  ;;  %v429_v30 = vsel %vm150_vm1, %v301_v4, %v149_v23  ;;  %250 = vmatpush.msra.mxu3 %v90_v3  ;;  %v89_v4 = vld [vmem:[#allocation4 + $0x1d0] sm:$0xff] }
  0x1e   :  { %v83_v23 = vld [vmem:[#allocation4 + $0x170] sm:$0xff] }
  0x1f   :  { %194 = vmatpush.msra.mxu2 %v69_v26  ;;  %251 = vmatpush.msra.mxu3 %v89_v4  ;;  %v82_v26 = vld [vmem:[#allocation4 + $0x160] sm:$0xff] }
  0x21   :  { %195 = vmatpush.msra.mxu2 %v68_v29  ;;  %252 = vmatpush.msra.mxu3 %v88_v8 }
  0x23   :  { %196 = vmatpush.msra.mxu2 %v67_v33  ;;  %253 = vmatpush.msra.mxu3 %v87_v11  ;;  %v79_v33 = vld [vmem:[#allocation4 + $0x130] sm:$0xff] }
  0x25   :  { %197 = vmatpush.msra.mxu2 %v66_v36 }
  0x27   :  { %198 = vmatpush.msra.mxu2 %v65_v37 }
  0x29   :  { %199 = vmatpush.msra.mxu2 %v64_v40 }
  0x2b   :  { %200 = vmatpush.msra.mxu2 %v63_v42 }
  0x2d   :  { %201 = vmatpush.msra.mxu2 %v62_v44 }
  0x8e   :  { %v423_v12 = vpop.f32.mrf.mxu0 }
  0x8f   :  { %v139_v13 = vrot.slane %v423_v12, 4  ;;  %v153_v14 = vmul.f32 %v423_v12, %v423_v12 }
  0x91   :  { %v140_v17 = vadd.f32 %v139_v13, %v423_v12  ;;  %v154_v18 = vrot.slane %v153_v14, 4 }
  0x93   :  { %v141_v20 = vrot.slane %v140_v17, 2  ;;  %v155_v21 = vadd.f32 %v154_v18, %v153_v14  ;;  %v86_v14 = vld [vmem:[#allocation4 + $0x1a0] sm:$0xff] }
  0x94   :  { %254 = vmatpush.msra.mxu3 %v86_v14 }
  0x95   :  { %v142_v24 = vadd.f32 %v141_v20, %v140_v17  ;;  %v156_v25 = vrot.slane %v155_v21, 2  ;;  %v85_v17 = vld [vmem:[#allocation4 + $0x190] sm:$0xff]  ;;  %v84_v20 = vld [vmem:[#allocation4 + $0x180] sm:$0xff] }
  0x96   :  { %255 = vmatpush.msra.mxu3 %v85_v17 }
  0x97   :  { %v143_v27 = vrot.slane %v142_v24, 1  ;;  %v157_v28 = vadd.f32 %v156_v25, %v155_v21 }
  0x98   :  { %256 = vmatpush.msra.mxu3 %v84_v20 }
  0x99   :  { %v144_v31 = vadd.f32 %v143_v27, %v142_v24  ;;  %v158_v32 = vrot.slane %v157_v28, 1  ;;  %v81_v27 = vld [vmem:[#allocation4 + $0x150] sm:$0xff] }
  0x9a   :  { %257 = vmatpush.msra.mxu3 %v83_v23 }
  0x9b   :  { %v152_v34 = vmul.f32 %v429_v30, %v144_v31  ;;  %v159_v35 = vadd.f32 %v158_v32, %v157_v28  ;;  %v80_v31 = vld [vmem:[#allocation4 + $0x140] sm:$0xff] }
  0x9c   :  { %258 = vmatpush.msra.mxu3 %v82_v26 }
  0x9d   :  { %v160_v38 = vmul.f32 %v159_v35, %v429_v30  ;;  %v161_v39 = vmul.f32 %v152_v34, %v152_v34  ;;  %v78_v35 = vld [vmem:[#allocation4 + $0x120] sm:$0xff] }
  0x9e   :  { %259 = vmatpush.msra.mxu3 %v81_v27 }
  0x9f   :  { %v162_v41 = vsub.f32 %v160_v38, %v161_v39 }
  0xa0   :  { %260 = vmatpush.msra.mxu3 %v80_v31 }
  0xa1   :  { %v163_v43 = vmax.f32 %v162_v41, 0.0 }
  0xa2   :  { %261 = vmatpush.msra.mxu3 %v79_v33 }
  0xa3   :  { %v164_v45 = vadd.f32 1e-05, %v163_v43 }
  0xa4   :  { %262 = vmatpush.msra.mxu3 %v78_v35 }
  0xa5   :  { %302 = vrsqrt.f32 %v164_v45  ;;  %vm171_vm3 = vweird.f32 %v164_v45 }
  0xab   :  { %v303_v46 = vpop.eup %302 }
  0xac   :  { %v166_v47 = vmul.f32 %v303_v46, %v164_v45  ;;  %vm172_vm2 = vweird.f32 %v303_v46 }
  0xad   :  { %vm173_vm4 = vmor %vm171_vm3, %vm172_vm2 }
  0xae   :  { %v167_v48 = vmul.f32 %v303_v46, %v166_v47 }
  0xb0   :  { %v168_v49 = vmul.f32 0.5, %v167_v48 }
  0xb2   :  { %v169_v50 = vsub.f32 1.5, %v168_v49 }
  0xb4   :  { %v170_v52 = vmul.f32 %v303_v46, %v169_v50 }
  0xb6   :  { %v174_v53 = vsel %vm173_vm4, %v303_v46, %v170_v52 }
  0xb7   :  { %v175_v54 = vmul.f32 %v174_v53, %v433_v51  ;;  %v61_v53 = vld [vmem:[#allocation4 + $0x18] sm:$0xff] }
  0xb8   :  { %133 = vmatpush.msra.mxu1 %v61_v53 }
  0xb9   :  { %v176_v55 = vmul.f32 %v175_v54, %v152_v34  ;;  %v181_v56 = vperm.slane %v175_v54, 0  ;;  %v59_v54 = vld [vmem:[#allocation4 + $0x8] sm:$0xff] }
  0xba   :  { %134 = vmatpush.msra.mxu1 %v59_v54 }
  0xbb   :  { %v178_v57 = vrot.slane %v176_v55, 7  ;;  %v182_v59 = vmul.f32 %v181_v56, %v423_v12  ;;  %292 = vmatmul.msk.f32.vlgmr.msra.gmra.mxu1 %vm95_vm0, %v419_v2  ;;  %v246_v55 = vperm.slane %v433_v51, 4 }
  0xbd   :  { %v180_v58 = vsub.f32 %v433_v51, %v178_v57 }
  0xbf   :  { %v183_v60 = vperm.slane %v180_v58, 1 }
  0xc1   :  { %v184_v61 = vadd.f32 %v183_v60, %v182_v59 }
  0xc3   :  { %v185_v62 = vmax.f32 %v184_v61, 0.0 }
  0xc5   :  { %202 = vmatmul.f32.vlgmr.msra.gmra.mxu2 %v185_v62 }
 0x138   :  { %v136_v59 = vpop.f32.mrf.mxu1 }
 0x139   :  { %293 = vst [vmem:[%s454_s3 + $0x8] sm:$0xff] %v136_v59 }
 0x148   :  { %v203_v5 = vpop.f32.mrf.mxu2 }
 0x149   :  { %v206_v6 = vrot.slane %v203_v5, 4  ;;  %v213_v7 = vmul.f32 %v203_v5, %v203_v5 }
 0x14b   :  { %v207_v9 = vadd.f32 %v206_v6, %v203_v5  ;;  %v214_v10 = vrot.slane %v213_v7, 4 }
 0x14d   :  { %v208_v12 = vrot.slane %v207_v9, 2  ;;  %v215_v13 = vadd.f32 %v214_v10, %v213_v7 }
 0x14f   :  { %v209_v15 = vadd.f32 %v208_v12, %v207_v9  ;;  %v216_v16 = vrot.slane %v215_v13, 2 }
 0x151   :  { %v210_v18 = vrot.slane %v209_v15, 1  ;;  %v217_v19 = vadd.f32 %v216_v16, %v215_v13 }
 0x153   :  { %v211_v21 = vadd.f32 %v210_v18, %v209_v15  ;;  %v218_v22 = vrot.slane %v217_v19, 1 }
 0x155   :  { %v212_v24 = vmul.f32 %v211_v21, %v429_v30  ;;  %v219_v25 = vadd.f32 %v218_v22, %v217_v19 }
 0x157   :  { %v220_v28 = vmul.f32 %v219_v25, %v429_v30  ;;  %v221_v29 = vmul.f32 %v212_v24, %v212_v24 }
 0x159   :  { %v222_v32 = vsub.f32 %v220_v28, %v221_v29 }
 0x15b   :  { %v223_v34 = vmax.f32 %v222_v32, 0.0 }
 0x15d   :  { %v224_v36 = vadd.f32 1e-05, %v223_v34 }
 0x15f   :  { %304 = vrsqrt.f32 %v224_v36  ;;  %vm231_vm6 = vweird.f32 %v224_v36 }
 0x165   :  { %v305_v37 = vpop.eup %304 }
 0x166   :  { %v226_v38 = vmul.f32 %v305_v37, %v224_v36  ;;  %vm232_vm5 = vweird.f32 %v305_v37 }
 0x167   :  { %vm233_vm7 = vmor %vm231_vm6, %vm232_vm5 }
 0x168   :  { %v227_v39 = vmul.f32 %v305_v37, %v226_v38 }
 0x16a   :  { %v228_v40 = vmul.f32 0.5, %v227_v39 }
 0x16c   :  { %v229_v41 = vsub.f32 1.5, %v228_v40 }
 0x16e   :  { %v230_v42 = vmul.f32 %v305_v37, %v229_v41 }
 0x170   :  { %v234_v30 = vsel %vm233_vm7, %v305_v37, %v230_v42 }
 0x171   :  { %v235_v43 = vmul.f32 %v234_v30, %v433_v51 }
 0x173   :  { %v236_v44 = vmul.f32 %v235_v43, %v212_v24  ;;  %v241_v45 = vperm.slane %v235_v43, 2 }
 0x175   :  { %v238_v46 = vrot.slane %v236_v44, 7  ;;  %v242_v48 = vmul.f32 %v241_v45, %v203_v5 }
 0x177   :  { %v240_v47 = vsub.f32 %v433_v51, %v238_v46 }
 0x179   :  { %v243_v49 = vperm.slane %v240_v47, 3 }
 0x17b   :  { %v244_v50 = vadd.f32 %v243_v49, %v242_v48 }
 0x17d   :  { %v245_v52 = vmax.f32 %v244_v50, 0.0 }
 0x17f   :  { %263 = vmatmul.f32.vlgmr.msra.gmra.mxu3 %v245_v52 }
 0x202   :  { %v264_v56 = vpop.f32.mrf.mxu3 }
 0x203   :  { %v265_v57 = vadd.f32 %v264_v56, %v246_v55 }
 0x205   :  { %v267_v58 = vmul.f32 %v265_v57, %v265_v57 }
 0x207   :  { %268 = vadd.xlane.f32.xlu0 %v267_v58 }
 0x27a   :  { %v269_v60 = vpop.xlane.xlu0 %268 }
 0x27b   :  { %v270_v61 = vmax.f32 %v269_v60, 1e-24 }
 0x27d   :  { %306 = vrsqrt.f32 %v270_v61  ;;  %vm277_vm9 = vweird.f32 %v270_v61 }
 0x283   :  { %v307_v62 = vpop.eup %306 }
 0x284   :  { %v272_v63 = vmul.f32 %v307_v62, %v270_v61  ;;  %vm278_vm8 = vweird.f32 %v307_v62 }
 0x285   :  { %vm279_vm10 = vmor %vm277_vm9, %vm278_vm8 }
 0x286   :  { %v273_v0 = vmul.f32 %v307_v62, %v272_v63 }
 0x288   :  { %v274_v1 = vmul.f32 0.5, %v273_v0 }
 0x28a   :  { %v275_v3 = vsub.f32 1.5, %v274_v1 }
 0x28c   :  { %v276_v2 = vmul.f32 %v307_v62, %v275_v3 }
 0x28e   :  { %v280_v51 = vsel %vm279_vm10, %v307_v62, %v276_v2 }
 0x28f   :  { %v281_v4 = vmul.f32 %v280_v51, %v265_v57 }
 0x291   :  { %282 = vst [vmem:[%s454_s3] sm:$0xff] %v281_v4 }
 0x292   :  { %289 = vsyncpa [#allocation3], 1 }
 0x293   :  { %290 = vsyncpa [#allocation5], 1 }

</bundles_post_ra>
